<compile_context>
chip_gen: v7x
topology: tpu7x:2x2x1
jax: 0.10.0
libtpu: 0.0.40
codegen_flags: <defaults>
</compile_context>

<pallas_src>
import jax
import jax.numpy as jnp
from jax.experimental import pallas as pl
from jax.experimental.pallas import tpu as pltpu


_NUM_CH = 19
_NUM_ROWS = 25

# Output row r of the flattened 5x5 grid (r = i*5 + j) -> source EEG channel,
# or None for the 6 channel-mean slots.  Columns j correspond to l1..l5:
#   j=0:  m  c0  m  c1  m
#   j=1:  c2 c3  c4 c5  c6
#   j=2:  c7 c8  c9 c10 c11
#   j=3:  c12 c13 c14 c15 c16
#   j=4:  m  c17 m  c18 m
_ROW_SRC = (
    None, 2, 7, 12, None,      # i = 0
    0, 3, 8, 13, 17,           # i = 1
    None, 4, 9, 14, None,      # i = 2
    1, 5, 10, 15, 18,          # i = 3
    None, 6, 11, 16, None,     # i = 4
)


def map_spatial_kernel(x_ref, o_ref):
    """x_ref block: (BB, 19, Tt)   o_ref block: (BB, 25, Tt)."""
    x = x_ref[...]                                        # one dense load
    # Channel mean in f32 (XLU sublane reduce; exact copies elsewhere).
    mean = (jnp.sum(x.astype(jnp.float32), axis=1, keepdims=True)
            * (1.0 / _NUM_CH)).astype(o_ref.dtype)        # (BB, 1, Tt)
    # Static row permutation + mean fill, assembled as one value so the
    # write-back is a single dense (lane-dense) store.
    rows = [mean if src is None else x[:, src:src + 1, :] for src in _ROW_SRC]
    o_ref[...] = jnp.concatenate(rows, axis=1)            # (BB, 25, Tt)


def _pick_time_tile(T):
    """Lane-dense time tile: multiple of 128 when possible, capped at 2048."""
    if T <= 128:
        return T                       # full (ragged-lane) extent; tiny case
    for cand in (2048, 1024, 512, 256, 128):
        if T % cand == 0:
            return cand                # divides T exactly: no masked tail
    # Not a multiple of 128: capped multiple of 128; the cdiv grid masks the
    # ragged tail block (no wrapper padding, bounded VMEM for huge T).
    return min(2048, (T // 128) * 128)


def map_spatial(x, *, step_bytes=8 * 1024 * 1024, max_bb=512):
    """MapSpatial forward: x (B, 19, 1, T) -> (B, 1, 5, 5, T)."""
    B, C, D, T = x.shape
    assert C == _NUM_CH and D == 1, (C, D)
    dt = x.dtype
    itemsize = jnp.dtype(dt).itemsize
    x3 = x.reshape(B, C, T)

    Tt = _pick_time_tile(T)
    # Batch enough examples per grid step that each step moves ~step_bytes of
    # HBM traffic ((19 + 25) rows * BB * Tt * itemsize), amortizing the
    # ~0.35 us per-step pipeline overhead.
    bb_cap = max(1, step_bytes // ((_NUM_CH + _NUM_ROWS) * Tt * itemsize))
    BB = max(1, min(B, bb_cap, max_bb))

    num_b = pl.cdiv(B, BB)
    num_t = pl.cdiv(T, Tt)
    # Keep >= 2 grid steps when possible so v7x's two TensorCores both get
    # work on the "parallel" axes (v5e/v6e are unaffected: 1 TC).
    if num_b * num_t == 1:
        if B > 1:
            BB = (B + 1) // 2
            num_b = pl.cdiv(B, BB)
        elif T >= 256:
            Tt = max(128, ((T // 2) // 128) * 128)
            num_t = pl.cdiv(T, Tt)

    out = pl.pallas_call(
        map_spatial_kernel,
        out_shape=jax.ShapeDtypeStruct((B, _NUM_ROWS, T), dt),
        grid=(num_b, num_t),
        in_specs=[
            # Second-to-last block dim equals the full channel extent (19/25),
            # satisfying the (8, 128) rule; Tt is lane-dense when T >= 128.
            pl.BlockSpec((BB, _NUM_CH, Tt), lambda b, t: (b, 0, t)),
        ],
        out_specs=pl.BlockSpec((BB, _NUM_ROWS, Tt), lambda b, t: (b, 0, t)),
        compiler_params=pltpu.CompilerParams(
            dimension_semantics=("parallel", "parallel"),
            vmem_limit_bytes=48 * 1024 * 1024),
    )(x3)

    # Glue: flat 25 rows (r = i*5 + j) -> 5x5 grid, add the spat[:, None]
    # axis.  Pure dim-split reshape: no data movement.
    return out.reshape(B, 1, 5, 5, T)


def map_spatial_ref(x):
    """Plain-JAX transcription of the PyTorch forward (for verification)."""
    m = jnp.mean(x, axis=1, keepdims=True)
    c = [x[:, i:i + 1] for i in range(x.shape[1])]
    l1 = jnp.concatenate((m, c[0], m, c[1], m), axis=1)
    l2 = jnp.concatenate(c[2:7], axis=1)
    l3 = jnp.concatenate(c[7:12], axis=1)
    l4 = jnp.concatenate(c[12:17], axis=1)
    l5 = jnp.concatenate((m, c[17], m, c[18], m), axis=1)
    spat = jnp.concatenate([l1, l2, l3, l4, l5], axis=2)
    return spat[:, None]


if __name__ == "__main__":
    key = jax.random.PRNGKey(0)
    B, C, D, T = 4, 19, 1, 256
    x = jax.random.normal(key, (B, C, D, T), dtype=jnp.float32)

    out = jax.block_until_ready(jax.jit(map_spatial)(x))
    ref = map_spatial_ref(x)

    assert out.shape == (B, 1, 5, 5, T), out.shape
    assert jnp.allclose(out, ref, atol=1e-5, rtol=1e-5), \
        float(jnp.max(jnp.abs(out - ref)))
    print("KERNEL_OK")
</pallas_src>

<mosaic_0001>
module attributes {stable_mosaic.version = 11 : i64} {
  func.func @map_spatial_kernel(%arg0: i32, %arg1: i32, %arg2: memref<2x19x256xf32, #tpu.memory_space<vmem>>, %arg3: memref<2x25x256xf32, #tpu.memory_space<vmem>>) attributes {dimension_semantics = [#tpu.dimension_semantics<parallel>, #tpu.dimension_semantics<parallel>], iteration_bounds = array<i64: 2, 1>, scalar_prefetch = 0 : i64, scratch_operands = 0 : i64, tpu.core_type = #tpu.core_type<tc>, window_params = [{transform_indices = @transform_0, window_bounds = array<i64: 2, 19, 256>}, {transform_indices = @transform_1, window_bounds = array<i64: 2, 25, 256>}]} {
    %c0 = arith.constant 0 : index
    %c0_0 = arith.constant 0 : index
    %c0_1 = arith.constant 0 : index
    %0 = vector.load %arg2[%c0, %c0_0, %c0_1] : memref<2x19x256xf32, #tpu.memory_space<vmem>>, vector<2x19x256xf32>
    %cst = arith.constant dense<0.000000e+00> : vector<2x256xf32>
    %1 = vector.multi_reduction <add>, %0, %cst [1] : vector<2x19x256xf32> to vector<2x256xf32>
    %2 = vector.shape_cast %1 : vector<2x256xf32> to vector<2x1x256xf32>
    %cst_2 = arith.constant 0.0526315793 : f32
    %3 = vector.broadcast %cst_2 : f32 to vector<2x1x256xf32>
    %4 = arith.mulf %2, %3 : vector<2x1x256xf32>
    %5 = vector.extract_strided_slice %0 {offsets = [0, 2, 0], sizes = [2, 1, 256], strides = [1, 1, 1]} : vector<2x19x256xf32> to vector<2x1x256xf32>
    %6 = vector.extract_strided_slice %0 {offsets = [0, 7, 0], sizes = [2, 1, 256], strides = [1, 1, 1]} : vector<2x19x256xf32> to vector<2x1x256xf32>
    %7 = vector.extract_strided_slice %0 {offsets = [0, 12, 0], sizes = [2, 1, 256], strides = [1, 1, 1]} : vector<2x19x256xf32> to vector<2x1x256xf32>
    %8 = vector.extract_strided_slice %0 {offsets = [0, 0, 0], sizes = [2, 1, 256], strides = [1, 1, 1]} : vector<2x19x256xf32> to vector<2x1x256xf32>
    %9 = vector.extract_strided_slice %0 {offsets = [0, 3, 0], sizes = [2, 1, 256], strides = [1, 1, 1]} : vector<2x19x256xf32> to vector<2x1x256xf32>
    %10 = vector.extract_strided_slice %0 {offsets = [0, 8, 0], sizes = [2, 1, 256], strides = [1, 1, 1]} : vector<2x19x256xf32> to vector<2x1x256xf32>
    %11 = vector.extract_strided_slice %0 {offsets = [0, 13, 0], sizes = [2, 1, 256], strides = [1, 1, 1]} : vector<2x19x256xf32> to vector<2x1x256xf32>
    %12 = vector.extract_strided_slice %0 {offsets = [0, 17, 0], sizes = [2, 1, 256], strides = [1, 1, 1]} : vector<2x19x256xf32> to vector<2x1x256xf32>
    %13 = vector.extract_strided_slice %0 {offsets = [0, 4, 0], sizes = [2, 1, 256], strides = [1, 1, 1]} : vector<2x19x256xf32> to vector<2x1x256xf32>
    %14 = vector.extract_strided_slice %0 {offsets = [0, 9, 0], sizes = [2, 1, 256], strides = [1, 1, 1]} : vector<2x19x256xf32> to vector<2x1x256xf32>
    %15 = vector.extract_strided_slice %0 {offsets = [0, 14, 0], sizes = [2, 1, 256], strides = [1, 1, 1]} : vector<2x19x256xf32> to vector<2x1x256xf32>
    %16 = vector.extract_strided_slice %0 {offsets = [0, 1, 0], sizes = [2, 1, 256], strides = [1, 1, 1]} : vector<2x19x256xf32> to vector<2x1x256xf32>
    %17 = vector.extract_strided_slice %0 {offsets = [0, 5, 0], sizes = [2, 1, 256], strides = [1, 1, 1]} : vector<2x19x256xf32> to vector<2x1x256xf32>
    %18 = vector.extract_strided_slice %0 {offsets = [0, 10, 0], sizes = [2, 1, 256], strides = [1, 1, 1]} : vector<2x19x256xf32> to vector<2x1x256xf32>
    %19 = vector.extract_strided_slice %0 {offsets = [0, 15, 0], sizes = [2, 1, 256], strides = [1, 1, 1]} : vector<2x19x256xf32> to vector<2x1x256xf32>
    %20 = vector.extract_strided_slice %0 {offsets = [0, 18, 0], sizes = [2, 1, 256], strides = [1, 1, 1]} : vector<2x19x256xf32> to vector<2x1x256xf32>
    %21 = vector.extract_strided_slice %0 {offsets = [0, 6, 0], sizes = [2, 1, 256], strides = [1, 1, 1]} : vector<2x19x256xf32> to vector<2x1x256xf32>
    %22 = vector.extract_strided_slice %0 {offsets = [0, 11, 0], sizes = [2, 1, 256], strides = [1, 1, 1]} : vector<2x19x256xf32> to vector<2x1x256xf32>
    %23 = vector.extract_strided_slice %0 {offsets = [0, 16, 0], sizes = [2, 1, 256], strides = [1, 1, 1]} : vector<2x19x256xf32> to vector<2x1x256xf32>
    %24 = tpu.concatenate %4, %5, %6, %7, %4, %8, %9, %10, %11, %12, %4, %13, %14, %15, %4, %16 in 1 : vector<2x1x256xf32>, vector<2x1x256xf32>, vector<2x1x256xf32>, vector<2x1x256xf32>, vector<2x1x256xf32>, vector<2x1x256xf32>, vector<2x1x256xf32>, vector<2x1x256xf32>, vector<2x1x256xf32>, vector<2x1x256xf32>, vector<2x1x256xf32>, vector<2x1x256xf32>, vector<2x1x256xf32>, vector<2x1x256xf32>, vector<2x1x256xf32>, vector<2x1x256xf32> -> vector<2x16x256xf32>
    %25 = tpu.concatenate %17, %18, %19, %20, %4, %21, %22, %23, %4 in 1 : vector<2x1x256xf32>, vector<2x1x256xf32>, vector<2x1x256xf32>, vector<2x1x256xf32>, vector<2x1x256xf32>, vector<2x1x256xf32>, vector<2x1x256xf32>, vector<2x1x256xf32>, vector<2x1x256xf32> -> vector<2x9x256xf32>
    %26 = tpu.concatenate %24, %25 in 1 : vector<2x16x256xf32>, vector<2x9x256xf32> -> vector<2x25x256xf32>
    %c0_3 = arith.constant 0 : index
    %c0_4 = arith.constant 0 : index
    %c0_5 = arith.constant 0 : index
    %27 = vector.load %arg3[%c0_3, %c0_4, %c0_5] : memref<2x25x256xf32, #tpu.memory_space<vmem>>, vector<2x25x256xf32>
    tpu.vector_store %arg3[%c0_3, %c0_4, %c0_5], %26 {strides = array<i32>} : memref<2x25x256xf32, #tpu.memory_space<vmem>>, vector<2x25x256xf32>,
    return
  }
  func.func @transform_0(%arg0: i32, %arg1: i32) -> (i32, i32, i32) {
    %c0_i32 = arith.constant 0 : i32
    %c0_i32_0 = arith.constant 0 : i32
    return %arg0, %c0_i32, %arg1 : i32, i32, i32
  }
  func.func @transform_1(%arg0: i32, %arg1: i32) -> (i32, i32, i32) {
    %c0_i32 = arith.constant 0 : i32
    %c0_i32_0 = arith.constant 0 : i32
    return %arg0, %c0_i32, %arg1 : i32, i32, i32
  }
}

</mosaic_0001>

<bundles_post_ra>
// kernel: map_spatial.1
= control target key start
LH: loop header
LB: loop body
LE: loop exit
PB: predicated region body
PF: predicated region fallthrough
CT: control target
= control target key end

     0   :  { %s561_s6 = smov 0   ;;  %s563_s7 = smov 0   ;;  %s866_s0 = inlined_call_operand.vmem [shape: f32[4,19,256], index: 0, kind: input, shape index: {}]   ;;  %s867_s1 = inlined_call_operand.vmem [shape: f32[4,25,256], index: 1, kind: output, shape index: {}]  }
   0x1   :  { %s565_s8 = smov 0  }
   0x2 LB: > { %s23_s9 = sadd.s32 1, %s545_s7  ;;  %p493_p0 = scmp.ge.s32.totalorder %s549_s8, 1  ;;  %s549_s8 = sphi %s565_s8, %s11_s8   ;;  %s545_s7 = sphi %s563_s7, %s869_s7   ;;  %s541_s6 = sphi %s561_s6, %s868_s6  }
   0x3   : > { %p25_p1 = scmp.ge.s32.totalorder %s23_s9, 2  ;;  %p110_p2 = scmp.lt.s32.totalorder %s549_s8, 3 }
   0x5   : > { %s871_s9 = smov (%p25_p1, %s23_s9), 0  ;;  %p111_p3 = pnand %p493_p0, %p110_p2 }
   0x6   : > { %s494_s10 = sshll.u32 (!%p111_p3), %s541_s6, 1  ;;  %vm177_vm0 = vcmask (!%p111_p3), 1042432   ;;  %vm273_vm1 = vcmask (!%p111_p3), 1040384   ;;  %vm278_vm2 = vcmask (!%p111_p3), 1041408   ;;  %vm287_vm3 = vcmask (!%p111_p3), 1043456  }
   0x7   : > { %114 = sbr.rel (%p111_p3) target bundleno = 63 (0x3f), region = 24  ;;  %p142_p4 = scmp.lt.s32.totalorder (!%p111_p3), %s494_s10, 3  ;;  %vm292_vm4 = vcmask (!%p111_p3), 1044480   ;;  %vm297_vm5 = vcmask (!%p111_p3), 1045504   ;;  %vm302_vm6 = vcmask (!%p111_p3), 1046528  }
   0xe   : > { %s873_s10 = smov (!%p142_p4, %s494_s10), 3 }
   0xf   : > { %s502_s11 = smul.u32 48, %s873_s10  ;;  %s501_s15 = sshll.u32 %s873_s10, 6 }
  0x10   : > { %s688_s18 = scalar_lea.vmem %s867_s1, %s501_s15 }
  0x11   : > { %s585_s14 = scalar_lea.vmem %s866_s0, %s502_s11 }
  0x12   : > { %v588_v0 = vld [vmem:[%s585_s14] sm:$0xff]  ;;  %v166_v1 = vld [vmem:[%s585_s14 + $0x10] sm:$0xff]  ;;  %v598_v5 = vld [vmem:[%s585_s14 + $0x8] sm:$0xff] }
  0x13   : > { %v592_v2 = vld [vmem:[%s585_s14 + $0x20] sm:$0x7]  ;;  %v176_v3 = vadd.f32 %v166_v1, %v588_v0  ;;  %v167_v6 = vld [vmem:[%s585_s14 + $0x18] sm:$0xff]  ;;  %v602_v7 = vld [vmem:[%s585_s14 + $0x28] sm:$0x7]  ;;  %v606_v10 = vrot.slane %v588_v0, 5 }
  0x14   : > { %v178_v4 = vsel %vm177_vm0, %v592_v2, 0.0  ;;  %v186_v8 = vadd.f32 %v167_v6, %v598_v5  ;;  %v608_v11 = vrot.slane %v166_v1, 1  ;;  %v187_v12 = vsel %vm177_vm0, %v602_v7, 0.0  ;;  %v623_v19 = vld [vmem:[%s585_s14 + $0x30] sm:$0xff]  ;;  %v172_v23 = vld [vmem:[%s585_s14 + $0x40] sm:$0xff]  ;;  %v647_v33 = vld [vmem:[%s585_s14 + $0x38] sm:$0xff] }
  0x15   : > { %v179_v9 = vadd.f32 %v178_v4, %v176_v3  ;;  %v612_v13 = vrot.slane %v166_v1, 5  ;;  %v615_v15 = vrot.slane %v598_v5, 5  ;;  %v617_v16 = vrot.slane %v167_v6, 1  ;;  %v630_v24 = vld [vmem:[%s585_s14 + $0x50] sm:$0x7]  ;;  %v654_v38 = vld [vmem:[%s585_s14 + $0x48] sm:$0xff] }
  0x16   : > { %v188_v14 = vadd.f32 %v187_v12, %v186_v8  ;;  %v620_v18 = vrot.slane %v588_v0, 1  ;;  %v249_v20 = vrot.slane %v588_v0, 3  ;;  %v626_v22 = vrot.slane %v167_v6, 5  ;;  %v657_v39 = vld [vmem:[%s585_s14 + $0x58] sm:$0x7] }
  0x17   : > { %v180_v17 = vrot.slane %v179_v9, 4  ;;  %v355_v26 = vsel %vm273_vm1, %v606_v10, %v608_v11  ;;  %v636_v27 = vrot.slane %v598_v5, 1  ;;  %v250_v28 = vrot.slane %v598_v5, 3 }
  0x18   : > { %v189_v21 = vrot.slane %v188_v14, 4  ;;  %v356_v30 = vsel %vm273_vm1, %v615_v15, %v617_v16  ;;  %v265_v31 = vrot.slane %v588_v0, 2  ;;  %v307_v32 = vsel %vm273_vm1, %v612_v13, %v592_v2 }
  0x19   : > { %v181_v25 = vadd.f32 %v180_v17, %v179_v9  ;;  %v266_v35 = vrot.slane %v598_v5, 2  ;;  %v195_v36 = vadd.f32 %v172_v23, %v623_v19  ;;  %v196_v37 = vsel %vm177_vm0, %v630_v24, 0.0 }
  0x1a   : > { %v190_v29 = vadd.f32 %v189_v21, %v188_v14  ;;  %v308_v41 = vsel %vm273_vm1, %v626_v22, %v602_v7  ;;  %v339_v42 = vrot.slane %v592_v2, 7  ;;  %v347_v43 = vrot.slane %v592_v2, 1 }
  0x1b   : > { %v182_v34 = vrot.slane %v181_v25, 2  ;;  %v359_v45 = vsel %vm278_vm2, %v355_v26, %v612_v13  ;;  %v340_v46 = vrot.slane %v602_v7, 7  ;;  %v197_v47 = vadd.f32 %v196_v37, %v195_v36 }
  0x1c   : > { %v191_v40 = vrot.slane %v190_v29, 2  ;;  %v360_v49 = vsel %vm278_vm2, %v356_v30, %v626_v22  ;;  %v204_v50 = vadd.f32 %v654_v38, %v647_v33  ;;  %v205_v51 = vsel %vm177_vm0, %v657_v39, 0.0 }
  0x1d   : > { %v183_v44 = vadd.f32 %v182_v34, %v181_v25  ;;  %v198_v53 = vrot.slane %v197_v47, 4  ;;  %v675_v54 = vrot.slane %v623_v19, 5  ;;  %v677_v55 = vrot.slane %v172_v23, 1 }
  0x1e   : > { %v192_v48 = vadd.f32 %v191_v40, %v190_v29  ;;  %v363_v57 = vsel %vm177_vm0, %v359_v45, %v339_v42  ;;  %v348_v58 = vrot.slane %v602_v7, 1  ;;  %v206_v59 = vadd.f32 %v205_v51, %v204_v50 }
  0x1f   : > { %v184_v52 = vrot.slane %v183_v44, 1  ;;  %v364_v61 = vsel %vm177_vm0, %v360_v49, %v340_v46  ;;  %v199_v62 = vadd.f32 %v198_v53, %v197_v47  ;;  %v683_v63 = vrot.slane %v623_v19, 1 }
  0x20   : > { %v193_v56 = vrot.slane %v192_v48, 1  ;;  %v251_v3 = vrot.slane %v623_v19, 3  ;;  %v691_v4 = vrot.slane %v172_v23, 5  ;;  %v207_v6 = vrot.slane %v206_v59, 4 }
  0x21   : > { %v185_v60 = vadd.f32 %v184_v52, %v183_v44  ;;  %v200_v9 = vrot.slane %v199_v62, 2  ;;  %v357_v12 = vsel %vm273_vm1, %v675_v54, %v677_v55  ;;  %v697_v14 = vrot.slane %v647_v33, 5 }
  0x22   : > { %v194_v1 = vadd.f32 %v193_v56, %v192_v48  ;;  %v208_v21 = vadd.f32 %v207_v6, %v206_v59  ;;  %v700_v25 = vrot.slane %v654_v38, 1  ;;  %v341_v26 = vrot.slane %v630_v24, 7 }
  0x23   : > { %v213_v8 = vmul.f32 0.05263158, %v185_v60  ;;  %v201_v34 = vadd.f32 %v200_v9, %v199_v62  ;;  %v361_v2 = vsel %vm278_vm2, %v357_v12, %v691_v4  ;;  %v252_v9 = vrot.slane %v647_v33, 3 }
  0x24   : > { %v214_v17 = vmul.f32 0.05263158, %v194_v1  ;;  %v260_v1 = vrot.slane %v654_v38, 5  ;;  %v309_v38 = vsel %vm273_vm1, %v691_v4, %v630_v24  ;;  %v267_v7 = vrot.slane %v623_v19, 2 }
  0x25   : > { %v274_v23 = vsel %vm273_vm1, %v213_v8, %v620_v18  ;;  %389 = vst [vmem:[%s688_s18 + $0x30] sm:$0x1] %v213_v8  ;;  %v311_v29 = vsel %vm278_vm2, %v307_v32, %v213_v8  ;;  %v367_v30 = vsel %vm287_vm3, %v363_v57, %v213_v8 }
  0x26   : > { %v279_v36 = vsel %vm278_vm2, %v274_v23, %v606_v10  ;;  %v275_v37 = vsel %vm273_vm1, %v214_v17, %v636_v27  ;;  %390 = vst [vmem:[%s688_s18 + $0x38] sm:$0x1] %v214_v17  ;;  %v315_v40 = vsel %vm177_vm0, %v311_v29, %v620_v18  ;;  %v312_v42 = vsel %vm278_vm2, %v308_v41, %v214_v17 }
  0x27   : > { %v283_v44 = vsel %vm177_vm0, %v279_v36, %v608_v11  ;;  %v280_v32 = vsel %vm278_vm2, %v275_v37, %v615_v15  ;;  %v319_v45 = vsel %vm287_vm3, %v315_v40, %v612_v13  ;;  %v316_v46 = vsel %vm177_vm0, %v312_v42, %v636_v27 }
  0x28   : > { %v288_v47 = vsel %vm287_vm3, %v283_v44, %v213_v8  ;;  %v284_v48 = vsel %vm177_vm0, %v280_v32, %v617_v16  ;;  %v323_v41 = vsel %vm292_vm4, %v319_v45, %v608_v11  ;;  %v320_v49 = vsel %vm287_vm3, %v316_v46, %v626_v22 }
  0x29   : > { %v293_v50 = vsel %vm292_vm4, %v288_v47, %v249_v20  ;;  %v289_v51 = vsel %vm287_vm3, %v284_v48, %v214_v17  ;;  %v327_v52 = vsel %vm297_vm5, %v323_v41, %v213_v8  ;;  %v324_v53 = vsel %vm292_vm4, %v320_v49, %v617_v16 }
  0x2a   : > { %v298_v56 = vsel %vm297_vm5, %v293_v50, %v606_v10  ;;  %v294_v57 = vsel %vm292_vm4, %v289_v51, %v250_v28  ;;  %v331_v59 = vsel %vm302_vm6, %v327_v52, %v265_v31  ;;  %v328_v20 = vsel %vm297_vm5, %v324_v53, %v214_v17 }
  0x2b   : > { %v303_v60 = vsel %vm302_vm6, %v298_v56, %v608_v11  ;;  %v299_v62 = vsel %vm297_vm5, %v294_v57, %v615_v15  ;;  %385 = vst [vmem:[%s688_s18 + $0x10] sm:$0xff] %v331_v59  ;;  %v332_v10 = vsel %vm302_vm6, %v328_v20, %v266_v35  ;;  %v371_v28 = vsel %vm292_vm4, %v367_v30, %v620_v18 }
  0x2c   : > { %383 = vst [vmem:[%s688_s18] sm:$0xff] %v303_v60  ;;  %v304_v0 = vsel %vm302_vm6, %v299_v62, %v617_v16  ;;  %386 = vst [vmem:[%s688_s18 + $0x18] sm:$0xff] %v332_v10  ;;  %v375_v11 = vsel %vm297_vm5, %v371_v28, %v612_v13  ;;  %v368_v31 = vsel %vm287_vm3, %v364_v61, %v214_v17  ;;  %v202_v15 = vrot.slane %v201_v34, 1 }
  0x2d   : > { %384 = vst [vmem:[%s688_s18 + $0x8] sm:$0xff] %v304_v0  ;;  %v379_v5 = vsel %vm302_vm6, %v375_v11, %v347_v43  ;;  %v372_v18 = vsel %vm292_vm4, %v368_v31, %v636_v27  ;;  %v209_v35 = vrot.slane %v208_v21, 2  ;;  %v358_v61 = vsel %vm273_vm1, %v697_v14, %v700_v25 }
  0x2e   : > { %387 = vst [vmem:[%s688_s18 + $0x20] sm:$0xff] %v379_v5  ;;  %v376_v16 = vsel %vm297_vm5, %v372_v18, %v626_v22  ;;  %v203_v13 = vadd.f32 %v202_v15, %v201_v34  ;;  %v365_v22 = vsel %vm177_vm0, %v361_v2, %v341_v26  ;;  %v224_v8 = vrot.slane %v647_v33, 1 }
  0x2f   : > { %v380_v27 = vsel %vm302_vm6, %v376_v16, %v348_v58  ;;  %v210_v43 = vadd.f32 %v209_v35, %v208_v21  ;;  %v342_v17 = vrot.slane %v657_v39, 7  ;;  %v349_v58 = vrot.slane %v630_v24, 1 }
  0x30   : > { %388 = vst [vmem:[%s688_s18 + $0x28] sm:$0xff] %v380_v27  ;;  %v215_v6 = vmul.f32 0.05263158, %v203_v13  ;;  %v362_v21 = vsel %vm278_vm2, %v358_v61, %v260_v1  ;;  %v310_v29 = vsel %vm273_vm1, %v260_v1, %v657_v39  ;;  %v350_v49 = vrot.slane %v657_v39, 1 }
  0x31   : > { %v211_v12 = vrot.slane %v210_v43, 1  ;;  %v366_v32 = vsel %vm177_vm0, %v362_v21, %v342_v17 }
  0x32   : > { %v276_v23 = vsel %vm273_vm1, %v215_v6, %v683_v63  ;;  %397 = vst [vmem:[%s688_s18 + $0x70] sm:$0x1] %v215_v6  ;;  %v313_v26 = vsel %vm278_vm2, %v309_v38, %v215_v6  ;;  %v369_v30 = vsel %vm287_vm3, %v365_v22, %v215_v6 }
  0x33   : > { %v281_v34 = vsel %vm278_vm2, %v276_v23, %v675_v54  ;;  %v212_v36 = vadd.f32 %v211_v12, %v210_v43  ;;  %v317_v24 = vsel %vm177_vm0, %v313_v26, %v683_v63  ;;  %v373_v37 = vsel %vm292_vm4, %v369_v30, %v683_v63 }
  0x34   : > { %v285_v40 = vsel %vm177_vm0, %v281_v34, %v677_v55  ;;  %v321_v42 = vsel %vm287_vm3, %v317_v24, %v691_v4  ;;  %v377_v44 = vsel %vm297_vm5, %v373_v37, %v691_v4  ;;  %v268_v4 = vrot.slane %v647_v33, 2 }
  0x35   : > { %v290_v45 = vsel %vm287_vm3, %v285_v40, %v215_v6  ;;  %v216_v46 = vmul.f32 0.05263158, %v212_v36  ;;  %v325_v47 = vsel %vm292_vm4, %v321_v42, %v677_v55  ;;  %v381_v63 = vsel %vm302_vm6, %v377_v44, %v349_v58 }
  0x36   : > { %v295_v48 = vsel %vm292_vm4, %v290_v45, %v251_v3  ;;  %v329_v41 = vsel %vm297_vm5, %v325_v47, %v215_v6  ;;  %395 = vst [vmem:[%s688_s18 + $0x60] sm:$0xff] %v381_v63 }
  0x37   : > { %v300_v50 = vsel %vm297_vm5, %v295_v48, %v675_v54  ;;  %v277_v51 = vsel %vm273_vm1, %v216_v46, %v224_v8  ;;  %398 = vst [vmem:[%s688_s18 + $0x78] sm:$0x1] %v216_v46  ;;  %v333_v52 = vsel %vm302_vm6, %v329_v41, %v267_v7  ;;  %v314_v19 = vsel %vm278_vm2, %v310_v29, %v216_v46 }
  0x38   : > { %v305_v3 = vsel %vm302_vm6, %v300_v50, %v677_v55  ;;  %v282_v53 = vsel %vm278_vm2, %v277_v51, %v697_v14  ;;  %393 = vst [vmem:[%s688_s18 + $0x50] sm:$0xff] %v333_v52  ;;  %v318_v33 = vsel %vm177_vm0, %v314_v19, %v224_v8  ;;  %v370_v39 = vsel %vm287_vm3, %v366_v32, %v216_v46 }
  0x39   : > { %391 = vst [vmem:[%s688_s18 + $0x40] sm:$0xff] %v305_v3  ;;  %v286_v54 = vsel %vm177_vm0, %v282_v53, %v700_v25  ;;  %v322_v56 = vsel %vm287_vm3, %v318_v33, %v260_v1  ;;  %v374_v57 = vsel %vm292_vm4, %v370_v39, %v224_v8 }
  0x3a   : > { %v291_v55 = vsel %vm287_vm3, %v286_v54, %v216_v46  ;;  %v326_v59 = vsel %vm292_vm4, %v322_v56, %v700_v25  ;;  %v378_v20 = vsel %vm297_vm5, %v374_v57, %v260_v1 }
  0x3b   : > { %v296_v60 = vsel %vm292_vm4, %v291_v55, %v252_v9  ;;  %v330_v62 = vsel %vm297_vm5, %v326_v59, %v216_v46  ;;  %v382_v10 = vsel %vm302_vm6, %v378_v20, %v350_v49 }
  0x3c   : > { %v301_v28 = vsel %vm297_vm5, %v296_v60, %v697_v14  ;;  %v334_v0 = vsel %vm302_vm6, %v330_v62, %v268_v4  ;;  %396 = vst [vmem:[%s688_s18 + $0x68] sm:$0xff] %v382_v10 }
  0x3d   : > { %v306_v11 = vsel %vm302_vm6, %v301_v28, %v700_v25  ;;  %394 = vst [vmem:[%s688_s18 + $0x58] sm:$0xff] %v334_v0 }
  0x3e   : > { %392 = vst [vmem:[%s688_s18 + $0x48] sm:$0xff] %v306_v11 }
  0x3f PF: > { %s11_s8 = sadd.s32 1, %s549_s8   ;;  %s868_s6 = smov %s545_s7 }
  0x40   : > { %p8_p5 = scmp.ge.s32.totalorder %s11_s8, 4   ;;  %s869_s7 = smov %s871_s9 }
  0x42   :  { %10 = sbr.rel (!%p8_p5) target bundleno = 2 (0x2), region = 54 }

</bundles_post_ra>
